<compile_context>
chip_gen: v6e
topology: v6e:2x2x1
jax: 0.10.0
libtpu: 0.0.40
codegen_flags: <defaults>
</compile_context>

<pallas_src>
import functools

import jax
import jax.numpy as jnp
from jax.experimental import pallas as pl
from jax.experimental.pallas import tpu as pltpu

LEAKY_SLOPE = 0.01  # torch.nn.LeakyReLU default negative_slope


def linear_kernel(x_ref, w_ref, b_ref, o_ref, *, activation):
    # x_ref: (tm, K)   w_ref: (K, tn)   b_ref: (1, tn)   o_ref: (tm, tn)
    y = jnp.dot(x_ref[...], w_ref[...], preferred_element_type=jnp.float32)
    y = y + b_ref[...]
    if activation:
        y = jnp.where(y > 0, y, LEAKY_SLOPE * y)
    o_ref[...] = y.astype(o_ref.dtype)


def linear_network(x, params, *, activation=True, dropout_rate=0.0):
    """x: (batch, in_features) float32 -> (batch, out_features) float32.

    params = (w, b) with w in (in_features, out_features) layout (transpose of
    the PyTorch nn.Linear weight) and b of shape (1, out_features).
    """
    # TODO(synk): training-mode dropout (dropout_rate > 0.0) would need
    # pltpu.prng_seed + pltpu.stateful_bernoulli inside the kernel; the module
    # default (rate 0.0, and eval mode) is the identity, so it is omitted.
    del dropout_rate
    w, b = params
    m, k = x.shape
    k2, n = w.shape
    assert k == k2 and b.shape == (1, n)

    # Keep the whole problem in one invocation when small; otherwise tile M/N.
    tm = m if m <= 256 else 256
    tn = n if n <= 512 else 512
    assert m % tm == 0 and n % tn == 0, "sizes chosen to divide evenly"

    kernel = functools.partial(linear_kernel, activation=activation)
    return pl.pallas_call(
        kernel,
        out_shape=jax.ShapeDtypeStruct((m, n), x.dtype),
        grid_spec=pltpu.PrefetchScalarGridSpec(
            num_scalar_prefetch=0,
            grid=(m // tm, n // tn),
            in_specs=[
                pl.BlockSpec((tm, k), lambda i, j: (i, 0)),
                pl.BlockSpec((k, tn), lambda i, j: (0, j)),
                pl.BlockSpec((1, tn), lambda i, j: (0, j)),
            ],
            out_specs=pl.BlockSpec((tm, tn), lambda i, j: (i, j)),
        ),
        compiler_params=pltpu.CompilerParams(
            dimension_semantics=("parallel", "parallel")),
    )(x, w, b)


def init_params(key, in_features, out_features):
    """Mirror PyTorch init: kaiming_normal_ weight (fan_in, gain=sqrt(2)),
    default nn.Linear uniform bias. Weight stored transposed: (in, out)."""
    kw, kb = jax.random.split(key)
    w_t = jax.random.normal(kw, (in_features, out_features), jnp.float32) * jnp.sqrt(
        2.0 / in_features)
    bound = 1.0 / jnp.sqrt(in_features)
    b = jax.random.uniform(kb, (1, out_features), jnp.float32, -bound, bound)
    return w_t, b


def reference_forward(x, params, *, activation=True):
    """Plain-JAX reference of the PyTorch forward (for correctness check)."""
    w, b = params
    y = x @ w + b
    if activation:
        y = jnp.where(y > 0, y, LEAKY_SLOPE * y)
    return y


if __name__ == "__main__":
    batch, in_features, out_features = 2, 32, 128

    key = jax.random.PRNGKey(0)
    k_x, k_p = jax.random.split(key)
    x = jax.random.normal(k_x, (batch, in_features), jnp.float32)
    params = init_params(k_p, in_features, out_features)

    run = jax.jit(functools.partial(linear_network, activation=True))
    out = run(x, params)
    out = jax.block_until_ready(out)

    assert out.shape == (batch, out_features), out.shape

    ref = reference_forward(x, params, activation=True)
    assert jnp.allclose(out, ref, rtol=1e-5, atol=1e-5), (
        float(jnp.max(jnp.abs(out - ref))))

    print("KERNEL_OK")
</pallas_src>

<mosaic_0001>
module attributes {stable_mosaic.version = 11 : i64} {
  func.func @linear_kernel(%arg0: i32, %arg1: i32, %arg2: memref<2x32xf32, #tpu.memory_space<vmem>>, %arg3: memref<32x128xf32, #tpu.memory_space<vmem>>, %arg4: memref<1x128xf32, #tpu.memory_space<vmem>>, %arg5: memref<2x128xf32, #tpu.memory_space<vmem>>) attributes {dimension_semantics = [#tpu.dimension_semantics<parallel>, #tpu.dimension_semantics<parallel>], iteration_bounds = array<i64: 1, 1>, scalar_prefetch = 0 : i64, scratch_operands = 0 : i64, tpu.core_type = #tpu.core_type<tc>, window_params = [{transform_indices = @transform_0, window_bounds = array<i64: 2, 32>}, {transform_indices = @transform_1, window_bounds = array<i64: 32, 128>}, {transform_indices = @transform_2, window_bounds = array<i64: 1, 128>}, {transform_indices = @transform_3, window_bounds = array<i64: 2, 128>}]} {
    %c0 = arith.constant 0 : index
    %c0_0 = arith.constant 0 : index
    %0 = vector.load %arg2[%c0, %c0_0] : memref<2x32xf32, #tpu.memory_space<vmem>>, vector<2x32xf32>
    %c0_1 = arith.constant 0 : index
    %c0_2 = arith.constant 0 : index
    %1 = vector.load %arg3[%c0_1, %c0_2] : memref<32x128xf32, #tpu.memory_space<vmem>>, vector<32x128xf32>
    %cst = arith.constant dense<0.000000e+00> : vector<2x128xf32>
    %2 = tpu.matmul %0, %1, %cst {dimension_numbers = #tpu.dot_dimension_numbers<[1], [0], [0], [1], [0, 0, 1, 1], [], []>} : vector<2x32xf32>, vector<32x128xf32>, vector<2x128xf32> -> vector<2x128xf32>
    %c0_3 = arith.constant 0 : index
    %c0_4 = arith.constant 0 : index
    %3 = vector.load %arg4[%c0_3, %c0_4] : memref<1x128xf32, #tpu.memory_space<vmem>>, vector<1x128xf32>
    %4 = vector.broadcast %3 : vector<1x128xf32> to vector<2x128xf32>
    %5 = arith.addf %2, %4 : vector<2x128xf32>
    %cst_5 = arith.constant 0.000000e+00 : f32
    %6 = vector.broadcast %cst_5 : f32 to vector<2x128xf32>
    %7 = arith.cmpf ogt, %5, %6 : vector<2x128xf32>
    %cst_6 = arith.constant 0.00999999977 : f32
    %8 = vector.broadcast %cst_6 : f32 to vector<2x128xf32>
    %9 = arith.mulf %8, %5 : vector<2x128xf32>
    %10 = arith.select %7, %5, %9 : vector<2x128xi1>, vector<2x128xf32>
    %c0_7 = arith.constant 0 : index
    %c0_8 = arith.constant 0 : index
    %11 = vector.load %arg5[%c0_7, %c0_8] : memref<2x128xf32, #tpu.memory_space<vmem>>, vector<2x128xf32>
    tpu.vector_store %arg5[%c0_7, %c0_8], %10 {strides = array<i32>} : memref<2x128xf32, #tpu.memory_space<vmem>>, vector<2x128xf32>,
    return
  }
  func.func @transform_0(%arg0: i32, %arg1: i32) -> (i32, i32) {
    %c0_i32 = arith.constant 0 : i32
    %c0_i32_0 = arith.constant 0 : i32
    return %arg0, %c0_i32 : i32, i32
  }
  func.func @transform_1(%arg0: i32, %arg1: i32) -> (i32, i32) {
    %c0_i32 = arith.constant 0 : i32
    %c0_i32_0 = arith.constant 0 : i32
    return %c0_i32, %arg1 : i32, i32
  }
  func.func @transform_2(%arg0: i32, %arg1: i32) -> (i32, i32) {
    %c0_i32 = arith.constant 0 : i32
    %c0_i32_0 = arith.constant 0 : i32
    return %c0_i32, %arg1 : i32, i32
  }
  func.func @transform_3(%arg0: i32, %arg1: i32) -> (i32, i32) {
    %c0_i32 = arith.constant 0 : i32
    return %arg0, %arg1 : i32, i32
  }
}

</mosaic_0001>

<bundles_post_ra>
// kernel: linear_network.1
= control target key start
LH: loop header
LB: loop body
LE: loop exit
PB: predicated region body
PF: predicated region fallthrough
CT: control target
= control target key end

     0   :  { %8 = vsyncpa [#allocation3], 0  ;;  %s277_s0 = inlined_call_operand.hbm [shape: f32[2,32], index: 0, kind: input, shape index: {}]   ;;  %s278_s1 = inlined_call_operand.hbm [shape: f32[32,128], index: 1, kind: input, shape index: {}]   ;;  %s279_s2 = inlined_call_operand.vmem [shape: f32[1,128], index: 2, kind: input, shape index: {}]   ;;  %s280_s3 = inlined_call_operand.hbm [shape: f32[2,128], index: 3, kind: output, shape index: {}]  }
   0x1   :  { %9 = vsyncpa [#allocation6], 0 }
   0x2   :  { %10 = vsyncpa [#allocation4], 0  ;;  %s238_s12 = smov [#allocation2]   ;;  %s239_s14 = smov [#allocation5]  }
   0x3   :  { %s17_s13 = sshll.u32 %s238_s12, 4  ;;  %s26_s15 = sshll.u32 %s239_s14, 4  ;;  %s18_s13 = int_to_ptr.vmem [resolvable:$true] %s17_s13  ;;  %s27_s15 = int_to_ptr.vmem [resolvable:$true] %s26_s15 }
   0x4   :  { %s180_s16 = scalar_lea.vmem %s18_s13, 32  ;;  %p185_p1 = scmp.lt.s32.totalorder %s18_s13, %s18_s13 }
   0x5   :  { %p181_p0 = scmp.ne.s32.totalorder %s18_s13, %s180_s16  ;;  %p186_p2 = scmp.lt.s32.totalorder %s180_s16, %s180_s16 }
   0x7   :  { %p187_p3 = por %p186_p2, %p185_p1 }
   0x9   :  { %p188_p4 = pnand %p187_p3, %p181_p0 }
   0xb   :  { %191 = shalt.err (!%p188_p4)
}
   0xc   :  { %20 = dma.hbm_to_vmem [thread:$0]  %s277_s0, 32, %s18_s13, [#allocation3]  }
   0xd   :  { %s200_s19 = scalar_lea.vmem %s27_s15, 512  ;;  %p205_p6 = scmp.lt.s32.totalorder %s27_s15, %s27_s15 }
   0xe   :  { %p201_p5 = scmp.ne.s32.totalorder %s27_s15, %s200_s19  ;;  %p206_p7 = scmp.lt.s32.totalorder %s200_s19, %s200_s19 }
  0x10   :  { %p207_p8 = por %p206_p7, %p205_p6 }
  0x12   :  { %p208_p9 = pnand %p207_p8, %p201_p5 }
  0x14   :  { %211 = shalt.err (!%p208_p9)
}
  0x15   :  { %s240_s20 = smov 128   ;;  %s241_s21 = smov 8  }
  0x16   :  { %32 = dma.hbm_to_vmem [thread:$0]  %s278_s1, 512, %s27_s15, [#allocation6], %s240_s20, %s240_s20, %s241_s21  }
  0x17   :  { %232 = dma.done.wait [#allocation3], 32  }
  0x18   :  { %233 = vsyncadd [#allocation3], 4294967264 }
  0x19   :  { %234 = dma.done.wait [#allocation6], 512  }
  0x1a   :  { %235 = vsyncadd [#allocation6], 4294966784  ;;  %v242_v0 = vmov 0.0   ;;  %vm243_vm0 = vmmov 0   ;;  %v45_v1 = vld [vmem:[#allocation5 + $0x18] sm:$0xff]  ;;  %v44_v2 = vld [vmem:[#allocation5 + $0x10] sm:$0xff] }
  0x1b   :  { %154 = vmatprep.subr.mxu0 %v242_v0  ;;  %162 = vmatprep.mubr.msk.f32.mxu0 %vm243_vm0, %v242_v0  ;;  %v43_v3 = vld [vmem:[#allocation5 + $0x8] sm:$0xff]  ;;  %v42_v4 = vld [vmem:[#allocation5] sm:$0xff]  ;;  %v41_v5 = vld [vmem:[#allocation2] sm:$0x3]  ;;  %vm53_vm1 = vcmask 261120   ;;  %s244_s24 = smov [#allocation7]  }
  0x1c   :  { %155 = vmatpush3.msra.mxu0 %v45_v1  ;;  %v147_v6 = vld [vmem:[%s279_s2] ss:$0 sm:$0xff]  ;;  %s137_s25 = sshll.u32 %s244_s24, 4  ;;  %s138_s25 = int_to_ptr.vmem [resolvable:$true] %s137_s25 }
  0x1d   :  { %156 = vmatprep.subr.mxu0 %v242_v0  ;;  %s212_s26 = scalar_lea.vmem %s138_s25, 32  ;;  %p217_p11 = scmp.lt.s32.totalorder %s138_s25, %s138_s25 }
  0x1e   :  { %157 = vmatpush3.msra.mxu0 %v44_v2  ;;  %p213_p10 = scmp.ne.s32.totalorder %s138_s25, %s212_s26  ;;  %p218_p12 = scmp.lt.s32.totalorder %s212_s26, %s212_s26 }
  0x1f   :  { %158 = vmatprep.subr.mxu0 %v242_v0 }
  0x20   :  { %159 = vmatpush3.msra.mxu0 %v43_v3  ;;  %p219_p13 = por %p218_p12, %p217_p11 }
  0x21   :  { %160 = vmatprep.subr.mxu0 %v242_v0 }
  0x22   :  { %161 = vmatpush3.msra.mxu0 %v42_v4  ;;  %p220_p0 = pnand %p219_p13, %p213_p10 }
  0x23   :  { %163 = vmatmul.mubr.msk.f32.vlgmr.msra.gmra.mxu0 %vm53_vm1, %v41_v5 }
  0xe3   :  { %v123_v7 = vpop.f32.mrf.mxu0 }
  0xe4   :  { %v124_v8 = vadd.f32 %v147_v6, %v123_v7 }
  0xe5   :  { %v164_v9 = vpop.f32.mrf.mxu0 }
  0xe6   :  { %v128_v10 = vmul.f32 0.01, %v124_v8  ;;  %vm127_vm2 = vcmp.gt.f32.partialorder %v124_v8, 0.0 }
  0xe8   :  { %v129_v11 = vsel %vm127_vm2, %v124_v8, %v128_v10 }
  0xe9   :  { %130 = vst [vmem:[#allocation7] sm:$0x3] %v129_v11 }
  0xea   :  { %223 = shalt.err (!%p220_p0)
}
  0xeb   :  { %140 = dma.vmem_to_hbm [thread:$0]  %s138_s25, 32, %s280_s3, [#allocation4]  }
  0xec   :  { %236 = dma.done.wait [#allocation4], 32  }
  0xed   :  { %237 = vsyncadd [#allocation4], 4294967264 }
  0xee   :  { %144 = vsyncpa [#allocation3], 1 }
  0xef   :  { %145 = vsyncpa [#allocation6], 1 }
  0xf0   :  { %146 = vsyncpa [#allocation4], 1 }

</bundles_post_ra>
